<compile_context>
chip_gen: v7x
topology: tpu7x:2x2x1
jax: 0.10.0
libtpu: 0.0.40
codegen_flags: <defaults>
</compile_context>

<pallas_src>
import jax
import jax.numpy as jnp
from jax.experimental import pallas as pl
from jax.experimental.pallas import tpu as pltpu


def _round_up(n, m):
    return ((n + m - 1) // m) * m


def _choose_block_b(B, *, min_steps=2, cap=256):
    # Multiple of 16 (bf16 sublane packing), >= min_steps grid steps, capped.
    tb = _round_up(pl.cdiv(B, min_steps), 16)
    return max(16, min(tb, cap))


def encoder_kernel(x_ref, w1_ref, b1_ref, wh_ref, bmu_ref, bvar_ref,
                   mu_ref, var_ref):
    z_pad = mu_ref.shape[-1]

    # Layer 1: hidden = relu(x @ W1 + b1); bf16 operands, f32 MXU accumulation.
    x_bf = x_ref[...].astype(w1_ref.dtype)
    h = jnp.dot(x_bf, w1_ref[...], preferred_element_type=jnp.float32)
    h = jnp.maximum(h + b1_ref[...], 0.0)            # f32 bias + ReLU (VPU)

    # Fused heads: one MXU pass over [Wmu_pad | Wvar_pad]; hidden stays in
    # vregs, cast-to-bf16 fused into the matmul feed (no VMEM round-trip).
    heads = jnp.dot(h.astype(wh_ref.dtype), wh_ref[...],
                    preferred_element_type=jnp.float32)

    # Two lane-dense outputs (each Z_pad = multiple of 128 lanes).
    mu_ref[...] = (heads[:, :z_pad] + bmu_ref[...]).astype(mu_ref.dtype)
    var_ref[...] = (heads[:, z_pad:] + bvar_ref[...]).astype(var_ref.dtype)


def prepare_encoder_params(w1, b1, wmu, bmu, wvar, bvar):
    """One-time packing: lane-dense padded bf16 weights, f32 biases.

    Weights are expected pre-transposed to [in, out]; biases [out] or [1, out].
    """
    f32, bf16 = jnp.float32, jnp.bfloat16
    K, H = w1.shape
    Z = wmu.shape[1]
    H_pad = _round_up(H, 128)
    Z_pad = _round_up(Z, 128)

    w1_p = jnp.zeros((K, H_pad), bf16).at[:, :H].set(w1.astype(bf16))
    b1_p = jnp.zeros((1, H_pad), f32).at[:, :H].set(b1.reshape(1, H).astype(f32))

    wh_p = jnp.zeros((H_pad, 2 * Z_pad), bf16)
    wh_p = wh_p.at[:H, :Z].set(wmu.astype(bf16))
    wh_p = wh_p.at[:H, Z_pad:Z_pad + Z].set(wvar.astype(bf16))
    bmu_p = jnp.zeros((1, Z_pad), f32).at[:, :Z].set(bmu.reshape(1, Z).astype(f32))
    bvar_p = jnp.zeros((1, Z_pad), f32).at[:, :Z].set(bvar.reshape(1, Z).astype(f32))

    return dict(w1=w1_p, b1=b1_p, wh=wh_p, bmu=bmu_p, bvar=bvar_p,
                K=K, H=H, Z=Z, H_pad=H_pad, Z_pad=Z_pad)


def encoder_forward(x, params, *, block_b=None, min_grid_steps=2,
                    single_buffer_weights=True):
    """x: [B, input_dim] float32. Returns (z_mu, z_var), each [B, z_dim] f32."""
    B, K = x.shape
    assert K == params["K"], "input_dim mismatch"
    H_pad, Z_pad, Z = params["H_pad"], params["Z_pad"], params["Z"]
    f32 = jnp.float32

    TB = _choose_block_b(B, min_steps=min_grid_steps) if block_b is None else block_b
    B_pad = _round_up(B, TB)
    if B_pad != B:
        x = jnp.zeros((B_pad, K), x.dtype).at[:B].set(x)

    grid = (B_pad // TB,)

    # Resident weights/biases: constant index_map; optionally single-buffered.
    def const_spec(shape):
        if single_buffer_weights:
            return pl.BlockSpec(shape, lambda i: (0, 0),
                                pipeline_mode=pl.Buffered(1))
        return pl.BlockSpec(shape, lambda i: (0, 0))

    wbuf = 1 if single_buffer_weights else 2
    vmem_needed = (2 * TB * K * 4                                    # x tiles (f32)
                   + wbuf * (K * H_pad + H_pad * 2 * Z_pad) * 2      # bf16 weights
                   + wbuf * (H_pad + 2 * Z_pad) * 4                  # f32 biases
                   + 2 * 2 * TB * Z_pad * 4)                         # mu/var out tiles
    vmem_limit = min(max(int(vmem_needed * 1.5) + (2 << 20), 32 << 20), 64 << 20)

    cost = pl.CostEstimate(
        flops=2 * B_pad * (K * H_pad + H_pad * 2 * Z_pad),
        transcendentals=0,
        bytes_accessed=(B_pad * K * 4
                        + (K * H_pad + H_pad * 2 * Z_pad) * 2
                        + (H_pad + 2 * Z_pad) * 4
                        + 2 * B_pad * Z_pad * 4),
    )

    mu_out, var_out = pl.pallas_call(
        encoder_kernel,
        out_shape=(jax.ShapeDtypeStruct((B_pad, Z_pad), f32),
                   jax.ShapeDtypeStruct((B_pad, Z_pad), f32)),
        grid_spec=pltpu.PrefetchScalarGridSpec(
            num_scalar_prefetch=0,
            grid=grid,
            in_specs=[
                pl.BlockSpec((TB, K), lambda i: (i, 0)),      # x: pipelined batch tiles
                const_spec((K, H_pad)),                       # w1 (VMEM-resident)
                const_spec((1, H_pad)),                       # b1
                const_spec((H_pad, 2 * Z_pad)),               # [Wmu | Wvar]
                const_spec((1, Z_pad)),                       # bmu
                const_spec((1, Z_pad)),                       # bvar
            ],
            out_specs=[
                pl.BlockSpec((TB, Z_pad), lambda i: (i, 0)),  # z_mu (lane-dense)
                pl.BlockSpec((TB, Z_pad), lambda i: (i, 0)),  # z_var (lane-dense)
            ],
        ),
        compiler_params=pltpu.CompilerParams(
            dimension_semantics=("parallel",),
            vmem_limit_bytes=vmem_limit),
        cost_estimate=cost,
    )(x, params["w1"], params["b1"], params["wh"], params["bmu"], params["bvar"])

    return mu_out[:B, :Z], var_out[:B, :Z]


def init_linear(key, in_features, out_features):
    """nn.Linear-style init (uniform +-1/sqrt(fan_in)); weight as [in, out]."""
    kw, kb = jax.random.split(key)
    bound = 1.0 / jnp.sqrt(in_features)
    w = jax.random.uniform(kw, (in_features, out_features), jnp.float32,
                           minval=-bound, maxval=bound)
    b = jax.random.uniform(kb, (1, out_features), jnp.float32,
                           minval=-bound, maxval=bound)
    return w, b


if __name__ == "__main__":
    # Small shapes consistent with Encoder.forward: x [batch, input_dim].
    batch, input_dim, hidden_dim, z_dim = 64, 64, 32, 16

    key = jax.random.PRNGKey(0)
    kx, k1, k2, k3 = jax.random.split(key, 4)

    x = jax.random.normal(kx, (batch, input_dim), jnp.float32)
    w1, b1 = init_linear(k1, input_dim, hidden_dim)
    wmu, bmu = init_linear(k2, hidden_dim, z_dim)
    wvar, bvar = init_linear(k3, hidden_dim, z_dim)

    params = prepare_encoder_params(w1, b1, wmu, bmu, wvar, bvar)

    try:
        z_mu, z_var = encoder_forward(x, params)           # TB=32 -> grid=(2,)
        jax.block_until_ready((z_mu, z_var))
    except Exception:
        # Fallback for JAX builds that reject single-buffered resident weights.
        z_mu, z_var = encoder_forward(x, params, single_buffer_weights=False)
        jax.block_until_ready((z_mu, z_var))

    # Reference mimicking the kernel's bf16 operand rounding (f32 accumulation).
    hp = jax.lax.Precision.HIGHEST
    rb = lambda a: a.astype(jnp.bfloat16).astype(jnp.float32)
    h_bf = jnp.maximum(jnp.dot(rb(x), rb(w1), precision=hp) + b1, 0.0)
    h_bf2 = rb(h_bf)
    mu_ref = jnp.dot(h_bf2, rb(wmu), precision=hp) + bmu
    var_ref = jnp.dot(h_bf2, rb(wvar), precision=hp) + bvar
    assert jnp.allclose(z_mu, mu_ref, atol=5e-3, rtol=5e-3), "mu mismatch"
    assert jnp.allclose(z_var, var_ref, atol=5e-3, rtol=5e-3), "var mismatch"

    # Loose sanity check vs the pure-f32 math of the PyTorch module.
    h32 = jnp.maximum(jnp.dot(x, w1, precision=hp) + b1, 0.0)
    assert jnp.allclose(z_mu, jnp.dot(h32, wmu, precision=hp) + bmu,
                        atol=0.1, rtol=0.1), "mu drift vs f32"
    assert jnp.allclose(z_var, jnp.dot(h32, wvar, precision=hp) + bvar,
                        atol=0.1, rtol=0.1), "var drift vs f32"

    print("KERNEL_OK")
</pallas_src>

<mosaic_0001>
module attributes {stable_mosaic.version = 11 : i64} {
  func.func @encoder_kernel(%arg0: i32, %arg1: memref<32x64xf32, #tpu.memory_space<vmem>>, %arg2: memref<64x128xbf16, #tpu.memory_space<vmem>>, %arg3: memref<1x128xf32, #tpu.memory_space<vmem>>, %arg4: memref<128x256xbf16, #tpu.memory_space<vmem>>, %arg5: memref<1x128xf32, #tpu.memory_space<vmem>>, %arg6: memref<1x128xf32, #tpu.memory_space<vmem>>, %arg7: memref<32x128xf32, #tpu.memory_space<vmem>>, %arg8: memref<32x128xf32, #tpu.memory_space<vmem>>) attributes {dimension_semantics = [#tpu.dimension_semantics<parallel>], iteration_bounds = array<i64: 2>, scalar_prefetch = 0 : i64, scratch_operands = 0 : i64, tpu.core_type = #tpu.core_type<tc>, window_params = [{transform_indices = @transform_0, window_bounds = array<i64: 32, 64>}, {pipeline_mode = #tpu.pipeline_mode<synchronous>, transform_indices = @transform_1, window_bounds = array<i64: 64, 128>}, {pipeline_mode = #tpu.pipeline_mode<synchronous>, transform_indices = @transform_2, window_bounds = array<i64: 1, 128>}, {pipeline_mode = #tpu.pipeline_mode<synchronous>, transform_indices = @transform_3, window_bounds = array<i64: 128, 256>}, {pipeline_mode = #tpu.pipeline_mode<synchronous>, transform_indices = @transform_4, window_bounds = array<i64: 1, 128>}, {pipeline_mode = #tpu.pipeline_mode<synchronous>, transform_indices = @transform_5, window_bounds = array<i64: 1, 128>}, {transform_indices = @transform_6, window_bounds = array<i64: 32, 128>}, {transform_indices = @transform_7, window_bounds = array<i64: 32, 128>}]} {
    %c0 = arith.constant 0 : index
    %c0_0 = arith.constant 0 : index
    %0 = vector.load %arg1[%c0, %c0_0] : memref<32x64xf32, #tpu.memory_space<vmem>>, vector<32x64xf32>
    %1 = arith.truncf %0 : vector<32x64xf32> to vector<32x64xbf16>
    %c0_1 = arith.constant 0 : index
    %c0_2 = arith.constant 0 : index
    %2 = vector.load %arg2[%c0_1, %c0_2] : memref<64x128xbf16, #tpu.memory_space<vmem>>, vector<64x128xbf16>
    %cst = arith.constant dense<0.000000e+00> : vector<32x128xf32>
    %3 = tpu.matmul %1, %2, %cst {dimension_numbers = #tpu.dot_dimension_numbers<[1], [0], [0], [1], [0, 0, 1, 1], [], []>} : vector<32x64xbf16>, vector<64x128xbf16>, vector<32x128xf32> -> vector<32x128xf32>
    %c0_3 = arith.constant 0 : index
    %c0_4 = arith.constant 0 : index
    %4 = vector.load %arg3[%c0_3, %c0_4] : memref<1x128xf32, #tpu.memory_space<vmem>>, vector<1x128xf32>
    %5 = vector.broadcast %4 : vector<1x128xf32> to vector<32x128xf32>
    %6 = arith.addf %3, %5 : vector<32x128xf32>
    %cst_5 = arith.constant 0.000000e+00 : f32
    %7 = vector.broadcast %cst_5 : f32 to vector<32x128xf32>
    %8 = arith.maximumf %6, %7 : vector<32x128xf32>
    %9 = arith.truncf %8 : vector<32x128xf32> to vector<32x128xbf16>
    %c0_6 = arith.constant 0 : index
    %c0_7 = arith.constant 0 : index
    %10 = vector.load %arg4[%c0_6, %c0_7] : memref<128x256xbf16, #tpu.memory_space<vmem>>, vector<128x256xbf16>
    %cst_8 = arith.constant dense<0.000000e+00> : vector<32x256xf32>
    %11 = tpu.matmul %9, %10, %cst_8 {dimension_numbers = #tpu.dot_dimension_numbers<[1], [0], [0], [1], [0, 0, 1, 1], [], []>} : vector<32x128xbf16>, vector<128x256xbf16>, vector<32x256xf32> -> vector<32x256xf32>
    %12 = vector.extract_strided_slice %11 {offsets = [0, 0], sizes = [32, 128], strides = [1, 1]} : vector<32x256xf32> to vector<32x128xf32>
    %c0_9 = arith.constant 0 : index
    %c0_10 = arith.constant 0 : index
    %13 = vector.load %arg5[%c0_9, %c0_10] : memref<1x128xf32, #tpu.memory_space<vmem>>, vector<1x128xf32>
    %14 = vector.broadcast %13 : vector<1x128xf32> to vector<32x128xf32>
    %15 = arith.addf %12, %14 : vector<32x128xf32>
    %c0_11 = arith.constant 0 : index
    %c0_12 = arith.constant 0 : index
    %16 = vector.load %arg7[%c0_11, %c0_12] : memref<32x128xf32, #tpu.memory_space<vmem>>, vector<32x128xf32>
    tpu.vector_store %arg7[%c0_11, %c0_12], %15 {strides = array<i32>} : memref<32x128xf32, #tpu.memory_space<vmem>>, vector<32x128xf32>,
    %17 = vector.extract_strided_slice %11 {offsets = [0, 128], sizes = [32, 128], strides = [1, 1]} : vector<32x256xf32> to vector<32x128xf32>
    %c0_13 = arith.constant 0 : index
    %c0_14 = arith.constant 0 : index
    %18 = vector.load %arg6[%c0_13, %c0_14] : memref<1x128xf32, #tpu.memory_space<vmem>>, vector<1x128xf32>
    %19 = vector.broadcast %18 : vector<1x128xf32> to vector<32x128xf32>
    %20 = arith.addf %17, %19 : vector<32x128xf32>
    %c0_15 = arith.constant 0 : index
    %c0_16 = arith.constant 0 : index
    %21 = vector.load %arg8[%c0_15, %c0_16] : memref<32x128xf32, #tpu.memory_space<vmem>>, vector<32x128xf32>
    tpu.vector_store %arg8[%c0_15, %c0_16], %20 {strides = array<i32>} : memref<32x128xf32, #tpu.memory_space<vmem>>, vector<32x128xf32>,
    return
  }
  func.func @transform_0(%arg0: i32) -> (i32, i32) {
    %c0_i32 = arith.constant 0 : i32
    %c0_i32_0 = arith.constant 0 : i32
    return %arg0, %c0_i32 : i32, i32
  }
  func.func @transform_1(%arg0: i32) -> (i32, i32) {
    %c0_i32 = arith.constant 0 : i32
    %c0_i32_0 = arith.constant 0 : i32
    %c0_i32_1 = arith.constant 0 : i32
    return %c0_i32, %c0_i32_0 : i32, i32
  }
  func.func @transform_2(%arg0: i32) -> (i32, i32) {
    %c0_i32 = arith.constant 0 : i32
    %c0_i32_0 = arith.constant 0 : i32
    %c0_i32_1 = arith.constant 0 : i32
    return %c0_i32, %c0_i32_0 : i32, i32
  }
  func.func @transform_3(%arg0: i32) -> (i32, i32) {
    %c0_i32 = arith.constant 0 : i32
    %c0_i32_0 = arith.constant 0 : i32
    %c0_i32_1 = arith.constant 0 : i32
    return %c0_i32, %c0_i32_0 : i32, i32
  }
  func.func @transform_4(%arg0: i32) -> (i32, i32) {
    %c0_i32 = arith.constant 0 : i32
    %c0_i32_0 = arith.constant 0 : i32
    %c0_i32_1 = arith.constant 0 : i32
    return %c0_i32, %c0_i32_0 : i32, i32
  }
  func.func @transform_5(%arg0: i32) -> (i32, i32) {
    %c0_i32 = arith.constant 0 : i32
    %c0_i32_0 = arith.constant 0 : i32
    %c0_i32_1 = arith.constant 0 : i32
    return %c0_i32, %c0_i32_0 : i32, i32
  }
  func.func @transform_6(%arg0: i32) -> (i32, i32) {
    %c0_i32 = arith.constant 0 : i32
    %c0_i32_0 = arith.constant 0 : i32
    return %arg0, %c0_i32 : i32, i32
  }
  func.func @transform_7(%arg0: i32) -> (i32, i32) {
    %c0_i32 = arith.constant 0 : i32
    %c0_i32_0 = arith.constant 0 : i32
    return %arg0, %c0_i32 : i32, i32
  }
}

module attributes {stable_mosaic.version = 11 : i64} {
  func.func @encoder_kernel(%arg0: i32, %arg1: memref<32x64xf32, #tpu.memory_space<vmem>>, %arg2: memref<64x128xbf16, #tpu.memory_space<vmem>>, %arg3: memref<1x128xf32, #tpu.memory_space<vmem>>, %arg4: memref<128x256xbf16, #tpu.memory_space<vmem>>, %arg5: memref<1x128xf32, #tpu.memory_space<vmem>>, %arg6: memref<1x128xf32, #tpu.memory_space<vmem>>, %arg7: memref<32x128xf32, #tpu.memory_space<vmem>>, %arg8: memref<32x128xf32, #tpu.memory_space<vmem>>) attributes {dimension_semantics = [#tpu.dimension_semantics<parallel>], iteration_bounds = array<i64: 2>, scalar_prefetch = 0 : i64, scratch_operands = 0 : i64, tpu.core_type = #tpu.core_type<tc>, window_params = [{transform_indices = @transform_0, window_bounds = array<i64: 32, 64>}, {pipeline_mode = #tpu.pipeline_mode<synchronous>, transform_indices = @transform_1, window_bounds = array<i64: 64, 128>}, {pipeline_mode = #tpu.pipeline_mode<synchronous>, transform_indices = @transform_2, window_bounds = array<i64: 1, 128>}, {pipeline_mode = #tpu.pipeline_mode<synchronous>, transform_indices = @transform_3, window_bounds = array<i64: 128, 256>}, {pipeline_mode = #tpu.pipeline_mode<synchronous>, transform_indices = @transform_4, window_bounds = array<i64: 1, 128>}, {pipeline_mode = #tpu.pipeline_mode<synchronous>, transform_indices = @transform_5, window_bounds = array<i64: 1, 128>}, {transform_indices = @transform_6, window_bounds = array<i64: 32, 128>}, {transform_indices = @transform_7, window_bounds = array<i64: 32, 128>}]} {
    %c0 = arith.constant 0 : index
    %c0_0 = arith.constant 0 : index
    %0 = vector.load %arg1[%c0, %c0_0] : memref<32x64xf32, #tpu.memory_space<vmem>>, vector<32x64xf32>
    %1 = arith.truncf %0 : vector<32x64xf32> to vector<32x64xbf16>
    %c0_1 = arith.constant 0 : index
    %c0_2 = arith.constant 0 : index
    %2 = vector.load %arg2[%c0_1, %c0_2] : memref<64x128xbf16, #tpu.memory_space<vmem>>, vector<64x128xbf16>
    %cst = arith.constant dense<0.000000e+00> : vector<32x128xf32>
    %3 = tpu.matmul %1, %2, %cst {dimension_numbers = #tpu.dot_dimension_numbers<[1], [0], [0], [1], [0, 0, 1, 1], [], []>} : vector<32x64xbf16>, vector<64x128xbf16>, vector<32x128xf32> -> vector<32x128xf32>
    %c0_3 = arith.constant 0 : index
    %c0_4 = arith.constant 0 : index
    %4 = vector.load %arg3[%c0_3, %c0_4] : memref<1x128xf32, #tpu.memory_space<vmem>>, vector<1x128xf32>
    %5 = vector.broadcast %4 : vector<1x128xf32> to vector<32x128xf32>
    %6 = arith.addf %3, %5 : vector<32x128xf32>
    %cst_5 = arith.constant 0.000000e+00 : f32
    %7 = vector.broadcast %cst_5 : f32 to vector<32x128xf32>
    %8 = arith.maximumf %6, %7 : vector<32x128xf32>
    %9 = arith.truncf %8 : vector<32x128xf32> to vector<32x128xbf16>
    %c0_6 = arith.constant 0 : index
    %c0_7 = arith.constant 0 : index
    %10 = vector.load %arg4[%c0_6, %c0_7] : memref<128x256xbf16, #tpu.memory_space<vmem>>, vector<128x256xbf16>
    %cst_8 = arith.constant dense<0.000000e+00> : vector<32x256xf32>
    %11 = tpu.matmul %9, %10, %cst_8 {dimension_numbers = #tpu.dot_dimension_numbers<[1], [0], [0], [1], [0, 0, 1, 1], [], []>} : vector<32x128xbf16>, vector<128x256xbf16>, vector<32x256xf32> -> vector<32x256xf32>
    %12 = vector.extract_strided_slice %11 {offsets = [0, 0], sizes = [32, 128], strides = [1, 1]} : vector<32x256xf32> to vector<32x128xf32>
    %c0_9 = arith.constant 0 : index
    %c0_10 = arith.constant 0 : index
    %13 = vector.load %arg5[%c0_9, %c0_10] : memref<1x128xf32, #tpu.memory_space<vmem>>, vector<1x128xf32>
    %14 = vector.broadcast %13 : vector<1x128xf32> to vector<32x128xf32>
    %15 = arith.addf %12, %14 : vector<32x128xf32>
    %c0_11 = arith.constant 0 : index
    %c0_12 = arith.constant 0 : index
    %16 = vector.load %arg7[%c0_11, %c0_12] : memref<32x128xf32, #tpu.memory_space<vmem>>, vector<32x128xf32>
    tpu.vector_store %arg7[%c0_11, %c0_12], %15 {strides = array<i32>} : memref<32x128xf32, #tpu.memory_space<vmem>>, vector<32x128xf32>,
    %17 = vector.extract_strided_slice %11 {offsets = [0, 128], sizes = [32, 128], strides = [1, 1]} : vector<32x256xf32> to vector<32x128xf32>
    %c0_13 = arith.constant 0 : index
    %c0_14 = arith.constant 0 : index
    %18 = vector.load %arg6[%c0_13, %c0_14] : memref<1x128xf32, #tpu.memory_space<vmem>>, vector<1x128xf32>
    %19 = vector.broadcast %18 : vector<1x128xf32> to vector<32x128xf32>
    %20 = arith.addf %17, %19 : vector<32x128xf32>
    %c0_15 = arith.constant 0 : index
    %c0_16 = arith.constant 0 : index
    %21 = vector.load %arg8[%c0_15, %c0_16] : memref<32x128xf32, #tpu.memory_space<vmem>>, vector<32x128xf32>
    tpu.vector_store %arg8[%c0_15, %c0_16], %20 {strides = array<i32>} : memref<32x128xf32, #tpu.memory_space<vmem>>, vector<32x128xf32>,
    return
  }
  func.func @transform_0(%arg0: i32) -> (i32, i32) {
    %c0_i32 = arith.constant 0 : i32
    %c0_i32_0 = arith.constant 0 : i32
    return %arg0, %c0_i32 : i32, i32
  }
  func.func @transform_1(%arg0: i32) -> (i32, i32) {
    %c0_i32 = arith.constant 0 : i32
    %c0_i32_0 = arith.constant 0 : i32
    %c0_i32_1 = arith.constant 0 : i32
    return %c0_i32, %c0_i32_0 : i32, i32
  }
  func.func @transform_2(%arg0: i32) -> (i32, i32) {
    %c0_i32 = arith.constant 0 : i32
    %c0_i32_0 = arith.constant 0 : i32
    %c0_i32_1 = arith.constant 0 : i32
    return %c0_i32, %c0_i32_0 : i32, i32
  }
  func.func @transform_3(%arg0: i32) -> (i32, i32) {
    %c0_i32 = arith.constant 0 : i32
    %c0_i32_0 = arith.constant 0 : i32
    %c0_i32_1 = arith.constant 0 : i32
    return %c0_i32, %c0_i32_0 : i32, i32
  }
  func.func @transform_4(%arg0: i32) -> (i32, i32) {
    %c0_i32 = arith.constant 0 : i32
    %c0_i32_0 = arith.constant 0 : i32
    %c0_i32_1 = arith.constant 0 : i32
    return %c0_i32, %c0_i32_0 : i32, i32
  }
  func.func @transform_5(%arg0: i32) -> (i32, i32) {
    %c0_i32 = arith.constant 0 : i32
    %c0_i32_0 = arith.constant 0 : i32
    %c0_i32_1 = arith.constant 0 : i32
    return %c0_i32, %c0_i32_0 : i32, i32
  }
  func.func @transform_6(%arg0: i32) -> (i32, i32) {
    %c0_i32 = arith.constant 0 : i32
    %c0_i32_0 = arith.constant 0 : i32
    return %arg0, %c0_i32 : i32, i32
  }
  func.func @transform_7(%arg0: i32) -> (i32, i32) {
    %c0_i32 = arith.constant 0 : i32
    %c0_i32_0 = arith.constant 0 : i32
    return %arg0, %c0_i32 : i32, i32
  }
}

</mosaic_0001>

<bundles_post_ra>
// kernel: tpu_custom_call.1
= control target key start
LH: loop header
LB: loop body
LE: loop exit
PB: predicated region body
PF: predicated region fallthrough
CT: control target
= control target key end

     0   :  { %13 = vsyncpa [#allocation3], 0  ;;  %s1496_s0 = inlined_call_operand.hbm [shape: f32[64,64], index: 0, kind: input, shape index: {}]   ;;  %s1497_s1 = inlined_call_operand.hbm [shape: bf16[64,128], index: 1, kind: input, shape index: {}]   ;;  %s1498_s2 = inlined_call_operand.vmem [shape: f32[1,128], index: 2, kind: input, shape index: {}]   ;;  %s1499_s3 = inlined_call_operand.hbm [shape: bf16[128,256], index: 3, kind: input, shape index: {}]   ;;  %s1500_s4 = inlined_call_operand.vmem [shape: f32[1,128], index: 4, kind: input, shape index: {}]   ;;  %s1501_s5 = inlined_call_operand.vmem [shape: f32[1,128], index: 5, kind: input, shape index: {}]   ;;  %s1502_s6 = inlined_call_operand.hbm [shape: f32[64,128], index: 6, kind: output, shape index: {0}]   ;;  %s1503_s7 = inlined_call_operand.hbm [shape: f32[64,128], index: 7, kind: output, shape index: {1}]  }
   0x1   :  { %15 = vsyncpa [#allocation3 + $0x1], 0 }
   0x2   :  { %16 = vsyncpa [#allocation6], 0 }
   0x3   :  { %17 = vsyncpa [#allocation4], 0 }
   0x4   :  { %19 = vsyncpa [#allocation4 + $0x1], 0 }
   0x5   :  { %20 = vsyncpa [#allocation10], 0 }
   0x6   :  { %22 = vsyncpa [#allocation10 + $0x1], 0  ;;  %s1203_s24 = smov 0   ;;  %s1205_s25 = smov 0  }
   0x7   :  { %s1207_s26 = smov 0   ;;  %s1209_s27 = smov 0  }
   0x8 LB: > { %s1224_s28 = sadd.s32 4294967295, %s1149_s27   ;;  %s786_s29 = sadd.s32 4294967294, %s1149_s27   ;;  %s1149_s27 = sphi %s1209_s27, %s1525_s27   ;;  %s1145_s26 = sphi %s1207_s26, %s1524_s26   ;;  %s1141_s25 = sphi %s1205_s25, %s1523_s25   ;;  %s1137_s24 = sphi %s1203_s24, %s1522_s24  }
   0x9   : > { %p48_p0 = scmp.ne.s32.totalorder %s1141_s25, %s1137_s24  ;;  %p1504_p1 = scmp.eq.s32.totalorder %s1224_s28, 0 }
   0xa   : > { %p183_p3 = scmp.eq.s32.totalorder %s786_s29, 1  ;;  %p787_p5 = scmp.ge.s32.totalorder %s1149_s27, 1 }
   0xb   : > { %p1233_p4 = por %p1504_p1, %p48_p0  ;;  %p216_p7 = scmp.lt.s32.totalorder %s1149_s27, 3 }
   0xc   : > { %p1238_p6 = por %p183_p3, %p48_p0  ;;  %s1151_s10 = smov [#allocation5]  }
   0xd   : > { %s1508_s30 = scalar_select %p1233_p4, 1, 0 }
   0xe   : > { %s1509_s8 = scalar_select %p1238_p6, 1, 0 }
   0xf   : > { %p1243_p8 = pnand %p787_p5, %p216_p7  ;;  %s228_s11 = sshll.u32 %s1151_s10, 4  ;;  %s1247_s11 = int_to_ptr.vmem [resolvable:$true] %s228_s11 }
  0x10   : > { %s1152_s13 = smov [#allocation7]   ;;  %s961_s17 = scalar_lea.hbm %s1497_s1, 512 }
  0x11   : > { %p868_p9 = pneg %p1243_p8  ;;  %s244_s14 = sshll.u32 %s1152_s13, 4  ;;  %s1258_s14 = int_to_ptr.vmem [resolvable:$true] %s244_s14 }
  0x12   : > { %p962_p12 = scmp.ne.s32.totalorder %s1497_s1, %s961_s17  ;;  %p968_p5 = scmp.lt.u32.totalorder %s961_s17, %s1497_s1 }
  0x13   : > { %p1254_p11 = pnand %p868_p9, %p1504_p1 }
  0x15   : > { %p963_p13 = pneg %p1254_p11 }
  0x17   : > { %p964_p0 = pnand %p963_p13, %p962_p12 }
  0x19   : > { %p965_p3 = pneg %p964_p0 }
  0x1b   : > { %p970_p7 = pnand %p968_p5, %p965_p3 }
  0x1d   : > { %973 = shalt.err (!%p970_p7)
}
  0x1e   : > { %s974_s22 = scalar_lea.vmem %s1247_s11, 512  ;;  %p982_p2 = scmp.lt.s32.totalorder %s1247_s11, %s1247_s11 }
  0x1f   : > { %p975_p9 = scmp.ne.s32.totalorder %s1247_s11, %s974_s22  ;;  %p983_p12 = scmp.lt.s32.totalorder %s974_s22, %s974_s22 }
  0x21   : > { %p977_p10 = pnand %p975_p9, %p963_p13  ;;  %p984_p0 = por %p983_p12, %p982_p2 }
  0x23   : > { %p978_p1 = pneg %p977_p10 }
  0x25   : > { %p985_p6 = pnand %p984_p0, %p978_p1 }
  0x27   : > { %988 = shalt.err (!%p985_p6)
}
  0x28   : > { %s1153_s23 = smov 64   ;;  %s1154_s29 = smov 4  }
  0x29   : > { %871 = dma.hbm_to_vmem [thread:$0]  (!%p1254_p11), %s1497_s1, 512, %s1247_s11, [#allocation6], %s1153_s23, %s1153_s23, %s1154_s29  }
  0x2a   : > { %s989_s17 = scalar_lea.hbm %s1499_s3, 2048 }
  0x2b   : > { %p990_p2 = scmp.ne.s32.totalorder %s1499_s3, %s989_s17  ;;  %p996_p10 = scmp.lt.u32.totalorder %s989_s17, %s1499_s3 }
  0x2d   : > { %p992_p1 = pnand %p990_p2, %p963_p13 }
  0x2f   : > { %p993_p6 = pneg %p992_p1 }
  0x31   : > { %p998_p3 = pnand %p996_p10, %p993_p6 }
  0x33   : > { %1001 = shalt.err (!%p998_p3)
}
  0x34   : > { %s1002_s11 = scalar_lea.vmem %s1258_s14, 2048  ;;  %p1010_p12 = scmp.lt.s32.totalorder %s1258_s14, %s1258_s14 }
  0x35   : > { %p1003_p5 = scmp.ne.s32.totalorder %s1258_s14, %s1002_s11  ;;  %p1011_p0 = scmp.lt.s32.totalorder %s1002_s11, %s1002_s11 }
  0x37   : > { %p1005_p7 = pnand %p1003_p5, %p963_p13  ;;  %p1012_p2 = por %p1011_p0, %p1010_p12 }
  0x39   : > { %p1006_p9 = pneg %p1005_p7 }
  0x3b   : > { %p1013_p1 = pnand %p1012_p2, %p1006_p9 }
  0x3d   : > { %1016 = shalt.err (!%p1013_p1)
}
  0x3e   : > { %s1505_s22 = smov 128   ;;  %s1156_s23 = smov 8  }
  0x3f   : > { %874 = dma.hbm_to_vmem [thread:$0]  (!%p1254_p11), %s1499_s3, 2048, %s1258_s14, [#allocation6], %s1505_s22, %s1505_s22, %s1156_s23  }
  0x40   : > { %s1316_s13 = sadd.s32 1, %s1149_s27   ;;  %s35_s16 = sadd.s32 1, %s1145_s26 }
  0x41   : > { %s32_s15 = ssub.s32 %s1149_s27, %s1316_s13  ;;  %p42_p6 = scmp.ne.s32.totalorder %s1145_s26, %s1141_s25 }
  0x42   : > { %p33_p13 = scmp.eq.s32.totalorder %s32_s15, 0  ;;  %p43_p10 = scmp.eq.s32.totalorder %s1149_s27, 0 }
  0x43   : > { %p1512_p5 = scmp.eq.s32.totalorder %s1224_s28, 1  ;;  %p888_p9 = scmp.lt.s32.totalorder %s1149_s27, 2 }
  0x44   : > { %s1325_s17 = scalar_select %p33_p13, %s1145_s26, %s35_s16  }
  0x45   : > { %p44_p3 = por %p43_p10, %p42_p6  ;;  %p1329_p7 = por %p1512_p5, %p42_p6 }
  0x46   : > { %s264_s18 = sand.u32 1, %s1145_s26   ;;  %s833_s14 = sshll.u32 %s1149_s27, 9 }
  0x47   : > { %s1513_s12 = scalar_select %p1329_p7, 1, 0 }
  0x48   : > { %s791_s19 = sshll.u32 %s264_s18, 5  ;;  %s1339_s11 = scalar_lea.hbm %s1496_s0, %s833_s14 }
  0x49   : > { %s268_s29 = scalar_lea.vmem [#allocation2], %s791_s19  ;;  %p1343_p11 = pnand %p888_p9, %p44_p3 }
  0x4a   : > { %s275_s10 = sshll.u32 %s268_s29, 4  ;;  %s1347_s16 = scalar_lea.sflag [#allocation3], %s264_s18  ;;  %s1341_s10 = int_to_ptr.vmem [resolvable:$true] %s275_s10 }
  0x4b   : > { %s1017_s22 = scalar_lea.hbm %s1339_s11, 512  ;;  %p1019_p0 = pneg %p1343_p11 }
  0x4c   : > { %p1018_p12 = scmp.ne.s32.totalorder %s1339_s11, %s1017_s22  ;;  %s1022_s20 = scalar_lea.hbm %s1496_s0, 1024 }
  0x4d   : > { %p1023_p13 = scmp.lt.u32.totalorder %s1339_s11, %s1496_s0  ;;  %p1024_p6 = scmp.lt.u32.totalorder %s1022_s20, %s1017_s22 }
  0x4e   : > { %p1020_p2 = pnand %p1019_p0, %p1018_p12  ;;  %p1026_p3 = scmp.lt.u32.totalorder %s1017_s22, %s1339_s11 }
  0x4f   : > { %p1025_p10 = por %p1024_p6, %p1023_p13 }
  0x50   : > { %p1021_p1 = pneg %p1020_p2 }
  0x51   : > { %p1027_p5 = por %p1026_p3, %p1025_p10 }
  0x53   : > { %p1028_p9 = pnand %p1027_p5, %p1021_p1 }
  0x55   : > { %1031 = shalt.err (!%p1028_p9)
}
  0x56   : > { %s1032_s18 = scalar_lea.vmem %s1341_s10, 512  ;;  %s1157_s19 = smov [#allocation2]  }
  0x57   : > { %p1033_p12 = scmp.ne.s32.totalorder %s1341_s10, %s1032_s18  ;;  %s1037_s14 = sshll.u32 %s1157_s19, 4  ;;  %s1038_s14 = int_to_ptr.vmem [resolvable:$false] %s1037_s14 }
  0x58   : > { %s1039_s21 = scalar_lea.vmem %s1038_s14, 1024  ;;  %p1040_p4 = scmp.lt.s32.totalorder %s1341_s10, %s1038_s14 }
  0x59   : > { %p1035_p2 = pnand %p1033_p12, %p1019_p0  ;;  %p1041_p13 = scmp.lt.s32.totalorder %s1039_s21, %s1032_s18 }
  0x5b   : > { %p1036_p7 = pneg %p1035_p2  ;;  %p1042_p6 = por %p1041_p13, %p1040_p4 }
  0x5d   : > { %p1043_p10 = pnand %p1042_p6, %p1036_p7 }
  0x5f   : > { %1046 = shalt.err (!%p1043_p10)
}
  0x60   : > { %s1515_s22 = smov 128   ;;  %287 = sbr.rel (%p1243_p8) target bundleno = 608 (0x260), region = 44 }
  0x61   : > { %878 = dma.hbm_to_vmem [thread:$0]  (!%p1343_p11), %s1339_s11, 512, %s1341_s10, %s1347_s16, %s1515_s22, %s1515_s22, %s1156_s23  }
  0x62   : > { %s1381_s20 = sand.u32 (!%p1243_p8), 1, %s1141_s25   ;;  %p1516_p4 = scmp.ne.s32.totalorder (!%p1243_p8), %s1508_s30, 0 }
  0x63   : > { %s1384_s29 = sshll.u32 (!%p1243_p8), %s1381_s20, 5  ;;  %s290_s15 = scalar_lea.sflag (!%p1243_p8), [#allocation3], %s1381_s20 }
  0x64   : > { %s293_s18 = scalar_lea.vmem (!%p1243_p8), [#allocation2], %s1384_s29 }
  0x67   : > { %1120 = dma.done.wait (%p1516_p4), %s290_s15, 512  }
  0x68   : > { %1122 = vsyncadd (%p1516_p4), %s290_s15, 4294966784  ;;  %p1517_p7 = scmp.eq.s32.totalorder %s1224_s28, 0 }
  0x6a   : > { %1124 = dma.done.wait (%p1517_p7), [#allocation6], 2560   ;;  %p1518_p8 = pmov %p1517_p7 }
  0x6b   : > { %v933_v0 = vld [vmem:[#allocation5] sm:$0xff]   ;;  %v934_v1 = vld [vmem:[#allocation5 + $0x8] sm:$0xff]   ;;  %v935_v2 = vld [vmem:[#allocation5 + $0x10] sm:$0xff]   ;;  %vm386_vm0 = vcmask 523264   ;;  %v1158_v26 = vmov 0   ;;  %s329_s19 = scalar_lea.vmem [#allocation8], %s1384_s29 }
  0x6c   : > { %1126 = vsyncadd (%p1518_p8), [#allocation6], 4294964736  ;;  %842 = vmatprep.subr.bf16.mxu0 %v933_v0  ;;  %v341_v3 = vld [vmem:[%s293_s18] sm:$0xff]  ;;  %v342_v4 = vld [vmem:[%s293_s18 + $0x8] sm:$0xff]  ;;  %576 = vmatprep.mubr.bf16.mxu1 %v1158_v26  ;;  %s336_s14 = scalar_lea.vmem [#allocation9], %s1384_s29  ;;  %s646_s21 = sshll.u32 %s329_s19, 4  ;;  %s1410_s21 = int_to_ptr.vmem [resolvable:$true] %s646_s21 }
  0x6d   : > { %843 = vmatpush3.bf16.msra.mxu0 %v933_v0  ;;  %v345_v5 = vpack.c.bf16 %v342_v4, %v341_v3  ;;  %v937_v6 = vld [vmem:[#allocation7 + $0x4] ss:$8 sps:$4 sm:$0xff]   ;;  %v939_v7 = vld [vmem:[#allocation7] ss:$8 sps:$4 sm:$0xff]   ;;  %v940_v8 = vld [vmem:[#allocation7 + $0x14] ss:$8 sps:$4 sm:$0xff]  }
  0x6e   : > { %844 = vmatprep.subr.bf16.mxu0 %v934_v1  ;;  %v936_v9 = vld [vmem:[#allocation5 + $0x18] sm:$0xff]   ;;  %544 = vmatprep.subr.bf16.mxu1 %v937_v6  ;;  %v943_v11 = vld [vmem:[#allocation7 + $0x24] ss:$8 sps:$4 sm:$0xff]   ;;  %v343_v12 = vld [vmem:[%s293_s18 + $0x10] sm:$0xff]  ;;  %s662_s22 = sshll.u32 %s336_s14, 4  ;;  %s834_s15 = sshll.u32 %s1224_s28, 9  ;;  %s1412_s22 = int_to_ptr.vmem [resolvable:$true] %s662_s22 }
  0x6f   : > { %850 = vmatprep.mubr.msk.bf16.mxu0 %vm386_vm0, %v345_v5  ;;  %545 = vmatpush1.bf16.msra.mxu1 %v939_v7  ;;  %v942_v10 = vld [vmem:[#allocation7 + $0x10] ss:$8 sps:$4 sm:$0xff]   ;;  %v945_v14 = vld [vmem:[#allocation7 + $0x20] ss:$8 sps:$4 sm:$0xff]   ;;  %v946_v16 = vld [vmem:[#allocation7 + $0x34] ss:$8 sps:$4 sm:$0xff]   ;;  %s1417_s30 = scalar_lea.hbm %s1502_s6, %s834_s15  ;;  %s1422_s23 = scalar_lea.hbm %s1503_s7, %s834_s15 }
  0x70   : > { %546 = vmatprep.subr.bf16.mxu1 %v940_v8  ;;  %v344_v13 = vld [vmem:[%s293_s18 + $0x18] sm:$0xff]  ;;  %v949_v18 = vld [vmem:[#allocation7 + $0x44] ss:$8 sps:$4 sm:$0xff]   ;;  %v951_v19 = vld [vmem:[#allocation7 + $0x40] ss:$8 sps:$4 sm:$0xff]   ;;  %s628_s11 = scalar_lea.sflag [#allocation4], %s1381_s20 }
  0x71   : > { %845 = vmatpush3.bf16.msra.mxu0 %v934_v1  ;;  %v346_v15 = vpack.c.bf16 %v344_v13, %v343_v12  ;;  %v948_v17 = vld [vmem:[#allocation7 + $0x30] ss:$8 sps:$4 sm:$0xff]   ;;  %v952_v20 = vld [vmem:[#allocation7 + $0x54] ss:$8 sps:$4 sm:$0xff]   ;;  %v955_v22 = vld [vmem:[#allocation7 + $0x64] ss:$8 sps:$4 sm:$0xff]  }
  0x72   : > { %846 = vmatprep.subr.bf16.mxu0 %v935_v2  ;;  %v954_v21 = vld [vmem:[#allocation7 + $0x50] ss:$8 sps:$4 sm:$0xff]   ;;  %v957_v23 = vld [vmem:[#allocation7 + $0x60] ss:$8 sps:$4 sm:$0xff]   ;;  %v958_v24 = vld [vmem:[#allocation7 + $0x74] ss:$8 sps:$4 sm:$0xff]  }
  0x73   : > { %547 = vmatpush1.bf16.msra.mxu1 %v942_v10  ;;  %v960_v25 = vld [vmem:[#allocation7 + $0x70] ss:$8 sps:$4 sm:$0xff]   ;;  %v800_v27 = vld [vmem:[%s1498_s2] ss:$0 sm:$0xff]  ;;  %s1047_s10 = scalar_lea.vmem %s1410_s21, 512  ;;  %p1519_p0 = scmp.ne.s32.totalorder %s1513_s12, 0 }
  0x74   : > { %548 = vmatprep.subr.bf16.mxu1 %v943_v11  ;;  %v823_v42 = vld [vmem:[%s1500_s4] ss:$0 sm:$0xff]  ;;  %p1048_p11 = scmp.ne.s32.totalorder %s1410_s21, %s1047_s10  ;;  %s1159_s16 = smov [#allocation8]  }
  0x75   : > { %847 = vmatpush3.bf16.msra.mxu0 %v935_v2  ;;  %v824_v43 = vld [vmem:[%s1501_s5] ss:$0 sm:$0xff]  ;;  %s1051_s29 = sshll.u32 %s1159_s16, 4  ;;  %s1052_s29 = int_to_ptr.vmem [resolvable:$false] %s1051_s29 }
  0x76   : > { %848 = vmatprep.subr.bf16.mxu0 %v936_v9  ;;  %p1049_p1 = pnand %p1048_p11, %p1519_p0  ;;  %s1053_s18 = scalar_lea.vmem %s1052_s29, 1024 }
  0x77   : > { %549 = vmatpush1.bf16.msra.mxu1 %v945_v14  ;;  %p1054_p5 = scmp.lt.s32.totalorder %s1410_s21, %s1052_s29  ;;  %p1055_p9 = scmp.lt.s32.totalorder %s1053_s18, %s1047_s10 }
  0x78   : > { %550 = vmatprep.subr.bf16.mxu1 %v946_v16  ;;  %p1050_p3 = pneg %p1049_p1 }
  0x79   : > { %849 = vmatpush3.bf16.msra.mxu0 %v936_v9  ;;  %p1056_p12 = por %p1055_p9, %p1054_p5 }
  0x7b   : > { %551 = vmatpush1.bf16.msra.mxu1 %v948_v17  ;;  %p1057_p2 = pnand %p1056_p12, %p1050_p3 }
  0x7c   : > { %851 = vmatmul.mubr.msk.bf16.vlgmr.msra.gmra.mrb[0].mxu0 %vm386_vm0, %v346_v15  ;;  %552 = vmatprep.subr.bf16.mxu1 %v949_v18 }
  0x7f   : > { %553 = vmatpush1.bf16.msra.mxu1 %v951_v19 }
  0x80   : > { %554 = vmatprep.subr.bf16.mxu1 %v952_v20 }
  0x83   : > { %555 = vmatpush1.bf16.msra.mxu1 %v954_v21 }
  0x84   : > { %556 = vmatprep.subr.bf16.mxu1 %v955_v22 }
  0x87   : > { %557 = vmatpush1.bf16.msra.mxu1 %v957_v23 }
  0x88   : > { %558 = vmatprep.subr.bf16.mxu1 %v958_v24 }
  0x8b   : > { %559 = vmatpush1.bf16.msra.mxu1 %v960_v25 }
 0x14f   : > { %v852_v28 = vpop.f32.mrb[0].mxu0 }
 0x150   : > { %v436_v29 = vadd.f32 %v852_v28, %v800_v27  ;;  %v427_v30 = vpop.f32.mrb[1].mxu0 }
 0x151   : > { %v428_v31 = vadd.f32 %v800_v27, %v427_v30  ;;  %v853_v32 = vpop.f32.mrb[2].mxu0 }
 0x152   : > { %v439_v33 = vadd.f32 %v853_v32, %v800_v27  ;;  %v430_v34 = vpop.f32.mrb[3].mxu0  ;;  %v444_v36 = vmax.f32 %v436_v29, 0.0 }
 0x153   : > { %v431_v35 = vadd.f32 %v800_v27, %v430_v34  ;;  %v442_v38 = vmax.f32 %v428_v31, 0.0 }
 0x154   : > { %v445_v37 = vmax.f32 %v439_v33, 0.0 }
 0x155   : > { %v443_v39 = vmax.f32 %v431_v35, 0.0 }
 0x156   : > { %v447_v40 = vpack.c.bf16 %v445_v37, %v444_v36 }
 0x157   : > { %v446_v41 = vpack.c.bf16 %v443_v39, %v442_v38 }
 0x159   : > { %577 = vmatmul.mubr.bf16.vlgmr.msra.gmra.mrb[0].mxu1 %v446_v41 }
 0x15a   : > { %586 = vmatprep.mubr.bf16.mxu1 %v1158_v26 }
 0x161   : > { %587 = vmatmul.mubr.bf16.gmra.mrb[4].mxu1 %v447_v40 }
 0x22c   : > { %v578_v44 = vpop.f32.mrb[0].mxu1 }
 0x22d   : > { %v604_v45 = vadd.f32 %v823_v42, %v578_v44  ;;  %v580_v46 = vpop.f32.mrb[1].mxu1 }
 0x22e   : > { %v619_v47 = vadd.f32 %v824_v43, %v580_v46  ;;  %v582_v48 = vpop.f32.mrb[2].mxu1 }
 0x22f   : > { %608 = vst [vmem:[%s329_s19] sm:$0xff] %v604_v45  ;;  %v605_v49 = vadd.f32 %v823_v42, %v582_v48  ;;  %v584_v50 = vpop.f32.mrb[3].mxu1 }
 0x230   : > { %623 = vst [vmem:[%s336_s14] sm:$0xff] %v619_v47  ;;  %v620_v51 = vadd.f32 %v824_v43, %v584_v50 }
 0x231   : > { %609 = vst [vmem:[%s329_s19 + $0x8] sm:$0xff] %v605_v49 }
 0x232   : > { %624 = vst [vmem:[%s336_s14 + $0x8] sm:$0xff] %v620_v51 }
 0x234   : > { %v588_v52 = vpop.f32.mrb[4].mxu1 }
 0x235   : > { %v606_v53 = vadd.f32 %v823_v42, %v588_v52  ;;  %v590_v54 = vpop.f32.mrb[5].mxu1 }
 0x236   : > { %v621_v55 = vadd.f32 %v824_v43, %v590_v54  ;;  %v592_v56 = vpop.f32.mrb[6].mxu1 }
 0x237   : > { %610 = vst [vmem:[%s329_s19 + $0x10] sm:$0xff] %v606_v53  ;;  %v607_v57 = vadd.f32 %v823_v42, %v592_v56  ;;  %v594_v58 = vpop.f32.mrb[7].mxu1 }
 0x238   : > { %625 = vst [vmem:[%s336_s14 + $0x10] sm:$0xff] %v621_v55  ;;  %v622_v59 = vadd.f32 %v824_v43, %v594_v58 }
 0x239   : > { %611 = vst [vmem:[%s329_s19 + $0x18] sm:$0xff] %v607_v57 }
 0x23a   : > { %626 = vst [vmem:[%s336_s14 + $0x18] sm:$0xff] %v622_v59 }
 0x23b   : > { %1060 = shalt.err (!%p1057_p2)
}
 0x23c   : > { %s1061_s19 = scalar_lea.hbm %s1417_s30, 512  ;;  %s1065_s28 = scalar_lea.hbm %s1502_s6, 1024 }
 0x23d   : > { %p1062_p13 = scmp.ne.s32.totalorder %s1417_s30, %s1061_s19  ;;  %p1066_p4 = scmp.lt.u32.totalorder %s1417_s30, %s1502_s6 }
 0x23e   : > { %p1067_p7 = scmp.lt.u32.totalorder %s1065_s28, %s1061_s19  ;;  %p1069_p11 = scmp.lt.u32.totalorder %s1061_s19, %s1417_s30 }
 0x23f   : > { %p1063_p6 = pnand %p1062_p13, %p1519_p0 }
 0x240   : > { %p1068_p8 = por %p1067_p7, %p1066_p4 }
 0x241   : > { %p1064_p10 = pneg %p1063_p6 }
 0x242   : > { %p1070_p1 = por %p1069_p11, %p1068_p8 }
 0x244   : > { %p1071_p3 = pnand %p1070_p1, %p1064_p10 }
 0x246   : > { %1074 = shalt.err (!%p1071_p3)
}
 0x247   : > { %s1160_s10 = smov 128   ;;  %s1161_s29 = smov 8  }
 0x248   : > { %864 = dma.vmem_to_hbm [thread:$0]  (%p1519_p0), %s1410_s21, 512, %s1417_s30, %s628_s11, %s1160_s10, %s1160_s10, %s1161_s29  }
 0x249   : > { %s633_s18 = scalar_lea.sflag [#allocation10], %s1381_s20  ;;  %s1075_s19 = scalar_lea.vmem %s1412_s22, 512 }
 0x24a   : > { %p1076_p5 = scmp.ne.s32.totalorder %s1412_s22, %s1075_s19  ;;  %s1162_s14 = smov [#allocation9]  }
 0x24b   : > { %s1079_s15 = sshll.u32 %s1162_s14, 4  ;;  %s1080_s15 = int_to_ptr.vmem [resolvable:$false] %s1079_s15 }
 0x24c   : > { %p1077_p9 = pnand %p1076_p5, %p1519_p0  ;;  %s1081_s28 = scalar_lea.vmem %s1080_s15, 1024 }
 0x24d   : > { %p1082_p2 = scmp.lt.s32.totalorder %s1412_s22, %s1080_s15  ;;  %p1083_p13 = scmp.lt.s32.totalorder %s1081_s28, %s1075_s19 }
 0x24e   : > { %p1078_p12 = pneg %p1077_p9 }
 0x24f   : > { %p1084_p6 = por %p1083_p13, %p1082_p2 }
 0x251   : > { %p1085_p10 = pnand %p1084_p6, %p1078_p12 }
 0x253   : > { %1088 = shalt.err (!%p1085_p10)
}
 0x254   : > { %s1089_s21 = scalar_lea.hbm %s1422_s23, 512  ;;  %s1093_s9 = scalar_lea.hbm %s1503_s7, 1024 }
 0x255   : > { %p1090_p4 = scmp.ne.s32.totalorder %s1422_s23, %s1089_s21  ;;  %p1094_p11 = scmp.lt.u32.totalorder %s1422_s23, %s1503_s7 }
 0x256   : > { %p1095_p1 = scmp.lt.u32.totalorder %s1093_s9, %s1089_s21  ;;  %p1097_p5 = scmp.lt.u32.totalorder %s1089_s21, %s1422_s23 }
 0x257   : > { %p1091_p7 = pnand %p1090_p4, %p1519_p0 }
 0x258   : > { %p1096_p3 = por %p1095_p1, %p1094_p11 }
 0x259   : > { %p1092_p8 = pneg %p1091_p7 }
 0x25a   : > { %p1098_p9 = por %p1097_p5, %p1096_p3 }
 0x25c   : > { %p1099_p12 = pnand %p1098_p9, %p1092_p8 }
 0x25e   : > { %1102 = shalt.err (!%p1099_p12)
}
 0x25f   : > { %865 = dma.vmem_to_hbm [thread:$0]  (%p1519_p0), %s1412_s22, 512, %s1422_s23, %s633_s18, %s1160_s10, %s1160_s10, %s1161_s29  }
 0x260 PF: > { %s677_s19 = sand.u32 1, %s1137_s24   ;;  %p1520_p2 = scmp.ne.s32.totalorder %s1509_s8, 0 }
 0x261   : > { %p1521_p13 = scmp.ge.s32.totalorder %s1149_s27, 2  ;;  %s678_s15 = scalar_lea.sflag [#allocation4], %s677_s19 }
 0x263   : > { %p880_p6 = pnand %p1521_p13, %p1520_p2 }
 0x265   : > { %1128 = dma.done.wait (!%p880_p6), %s678_s15, 512  }
 0x266   : > { %1130 = vsyncadd (!%p880_p6), %s678_s15, 4294966784  ;;  %s687_s12 = scalar_lea.sflag [#allocation10], %s677_s19 }
 0x267   : > { %1132 = dma.done.wait (!%p880_p6), %s687_s12, 512  }
 0x268   : > { %1134 = vsyncadd (!%p880_p6), %s687_s12, 4294966784  ;;  %p25_p0 = scmp.ge.s32.totalorder %s1316_s13, 4   ;;  %s1522_s24 = smov %s1141_s25 }
 0x269   : > { %s1523_s25 = smov %s1145_s26  ;;  %s1524_s26 = smov %s1325_s17 }
 0x26a   : > { %s1525_s27 = smov %s1316_s13  ;;  %27 = sbr.rel (!%p25_p0) target bundleno = 8 (0x8), region = 114 }
 0x271   :  { %692 = vsyncpa [#allocation3], 1 }
 0x272   :  { %694 = vsyncpa [#allocation3 + $0x1], 1 }
 0x273   :  { %695 = vsyncpa [#allocation6], 1 }
 0x274   :  { %696 = vsyncpa [#allocation4], 1 }
 0x275   :  { %698 = vsyncpa [#allocation4 + $0x1], 1 }
 0x276   :  { %699 = vsyncpa [#allocation10], 1 }
 0x277   :  { %701 = vsyncpa [#allocation10 + $0x1], 1 }

// kernel: tpu_custom_call.1
= control target key start
LH: loop header
LB: loop body
LE: loop exit
PB: predicated region body
PF: predicated region fallthrough
CT: control target
= control target key end

     0   :  { %13 = vsyncpa [#allocation3], 0  ;;  %s1496_s0 = inlined_call_operand.hbm [shape: f32[64,64], index: 0, kind: input, shape index: {}]   ;;  %s1497_s1 = inlined_call_operand.hbm [shape: bf16[64,128], index: 1, kind: input, shape index: {}]   ;;  %s1498_s2 = inlined_call_operand.vmem [shape: f32[1,128], index: 2, kind: input, shape index: {}]   ;;  %s1499_s3 = inlined_call_operand.hbm [shape: bf16[128,256], index: 3, kind: input, shape index: {}]   ;;  %s1500_s4 = inlined_call_operand.vmem [shape: f32[1,128], index: 4, kind: input, shape index: {}]   ;;  %s1501_s5 = inlined_call_operand.vmem [shape: f32[1,128], index: 5, kind: input, shape index: {}]   ;;  %s1502_s6 = inlined_call_operand.hbm [shape: f32[64,128], index: 6, kind: output, shape index: {0}]   ;;  %s1503_s7 = inlined_call_operand.hbm [shape: f32[64,128], index: 7, kind: output, shape index: {1}]  }
   0x1   :  { %15 = vsyncpa [#allocation3 + $0x1], 0 }
   0x2   :  { %16 = vsyncpa [#allocation6], 0 }
   0x3   :  { %17 = vsyncpa [#allocation4], 0 }
   0x4   :  { %19 = vsyncpa [#allocation4 + $0x1], 0 }
   0x5   :  { %20 = vsyncpa [#allocation10], 0 }
   0x6   :  { %22 = vsyncpa [#allocation10 + $0x1], 0  ;;  %s1203_s24 = smov 0   ;;  %s1205_s25 = smov 0  }
   0x7   :  { %s1207_s26 = smov 0   ;;  %s1209_s27 = smov 0  }
   0x8 LB: > { %s1224_s28 = sadd.s32 4294967295, %s1149_s27   ;;  %s786_s29 = sadd.s32 4294967294, %s1149_s27   ;;  %s1149_s27 = sphi %s1209_s27, %s1525_s27   ;;  %s1145_s26 = sphi %s1207_s26, %s1524_s26   ;;  %s1141_s25 = sphi %s1205_s25, %s1523_s25   ;;  %s1137_s24 = sphi %s1203_s24, %s1522_s24  }
   0x9   : > { %p48_p0 = scmp.ne.s32.totalorder %s1141_s25, %s1137_s24  ;;  %p1504_p1 = scmp.eq.s32.totalorder %s1224_s28, 0 }
   0xa   : > { %p183_p3 = scmp.eq.s32.totalorder %s786_s29, 1  ;;  %p787_p5 = scmp.ge.s32.totalorder %s1149_s27, 1 }
   0xb   : > { %p1233_p4 = por %p1504_p1, %p48_p0  ;;  %p216_p7 = scmp.lt.s32.totalorder %s1149_s27, 3 }
   0xc   : > { %p1238_p6 = por %p183_p3, %p48_p0  ;;  %s1151_s10 = smov [#allocation5]  }
   0xd   : > { %s1508_s30 = scalar_select %p1233_p4, 1, 0 }
   0xe   : > { %s1509_s8 = scalar_select %p1238_p6, 1, 0 }
   0xf   : > { %p1243_p8 = pnand %p787_p5, %p216_p7  ;;  %s228_s11 = sshll.u32 %s1151_s10, 4  ;;  %s1247_s11 = int_to_ptr.vmem [resolvable:$true] %s228_s11 }
  0x10   : > { %s1152_s13 = smov [#allocation7]   ;;  %s961_s17 = scalar_lea.hbm %s1497_s1, 512 }
  0x11   : > { %p868_p9 = pneg %p1243_p8  ;;  %s244_s14 = sshll.u32 %s1152_s13, 4  ;;  %s1258_s14 = int_to_ptr.vmem [resolvable:$true] %s244_s14 }
  0x12   : > { %p962_p12 = scmp.ne.s32.totalorder %s1497_s1, %s961_s17  ;;  %p968_p5 = scmp.lt.u32.totalorder %s961_s17, %s1497_s1 }
  0x13   : > { %p1254_p11 = pnand %p868_p9, %p1504_p1 }
  0x15   : > { %p963_p13 = pneg %p1254_p11 }
  0x17   : > { %p964_p0 = pnand %p963_p13, %p962_p12 }
  0x19   : > { %p965_p3 = pneg %p964_p0 }
  0x1b   : > { %p970_p7 = pnand %p968_p5, %p965_p3 }
  0x1d   : > { %973 = shalt.err (!%p970_p7)
}
  0x1e   : > { %s974_s22 = scalar_lea.vmem %s1247_s11, 512  ;;  %p982_p2 = scmp.lt.s32.totalorder %s1247_s11, %s1247_s11 }
  0x1f   : > { %p975_p9 = scmp.ne.s32.totalorder %s1247_s11, %s974_s22  ;;  %p983_p12 = scmp.lt.s32.totalorder %s974_s22, %s974_s22 }
  0x21   : > { %p977_p10 = pnand %p975_p9, %p963_p13  ;;  %p984_p0 = por %p983_p12, %p982_p2 }
  0x23   : > { %p978_p1 = pneg %p977_p10 }
  0x25   : > { %p985_p6 = pnand %p984_p0, %p978_p1 }
  0x27   : > { %988 = shalt.err (!%p985_p6)
}
  0x28   : > { %s1153_s23 = smov 64   ;;  %s1154_s29 = smov 4  }
  0x29   : > { %871 = dma.hbm_to_vmem [thread:$0]  (!%p1254_p11), %s1497_s1, 512, %s1247_s11, [#allocation6], %s1153_s23, %s1153_s23, %s1154_s29  }
  0x2a   : > { %s989_s17 = scalar_lea.hbm %s1499_s3, 2048 }
  0x2b   : > { %p990_p2 = scmp.ne.s32.totalorder %s1499_s3, %s989_s17  ;;  %p996_p10 = scmp.lt.u32.totalorder %s989_s17, %s1499_s3 }
  0x2d   : > { %p992_p1 = pnand %p990_p2, %p963_p13 }
  0x2f   : > { %p993_p6 = pneg %p992_p1 }
  0x31   : > { %p998_p3 = pnand %p996_p10, %p993_p6 }
  0x33   : > { %1001 = shalt.err (!%p998_p3)
}
  0x34   : > { %s1002_s11 = scalar_lea.vmem %s1258_s14, 2048  ;;  %p1010_p12 = scmp.lt.s32.totalorder %s1258_s14, %s1258_s14 }
  0x35   : > { %p1003_p5 = scmp.ne.s32.totalorder %s1258_s14, %s1002_s11  ;;  %p1011_p0 = scmp.lt.s32.totalorder %s1002_s11, %s1002_s11 }
  0x37   : > { %p1005_p7 = pnand %p1003_p5, %p963_p13  ;;  %p1012_p2 = por %p1011_p0, %p1010_p12 }
  0x39   : > { %p1006_p9 = pneg %p1005_p7 }
  0x3b   : > { %p1013_p1 = pnand %p1012_p2, %p1006_p9 }
  0x3d   : > { %1016 = shalt.err (!%p1013_p1)
}
  0x3e   : > { %s1505_s22 = smov 128   ;;  %s1156_s23 = smov 8  }
  0x3f   : > { %874 = dma.hbm_to_vmem [thread:$0]  (!%p1254_p11), %s1499_s3, 2048, %s1258_s14, [#allocation6], %s1505_s22, %s1505_s22, %s1156_s23  }
  0x40   : > { %s1316_s13 = sadd.s32 1, %s1149_s27   ;;  %s35_s16 = sadd.s32 1, %s1145_s26 }
  0x41   : > { %s32_s15 = ssub.s32 %s1149_s27, %s1316_s13  ;;  %p42_p6 = scmp.ne.s32.totalorder %s1145_s26, %s1141_s25 }
  0x42   : > { %p33_p13 = scmp.eq.s32.totalorder %s32_s15, 0  ;;  %p43_p10 = scmp.eq.s32.totalorder %s1149_s27, 0 }
  0x43   : > { %p1512_p5 = scmp.eq.s32.totalorder %s1224_s28, 1  ;;  %p888_p9 = scmp.lt.s32.totalorder %s1149_s27, 2 }
  0x44   : > { %s1325_s17 = scalar_select %p33_p13, %s1145_s26, %s35_s16  }
  0x45   : > { %p44_p3 = por %p43_p10, %p42_p6  ;;  %p1329_p7 = por %p1512_p5, %p42_p6 }
  0x46   : > { %s264_s18 = sand.u32 1, %s1145_s26   ;;  %s833_s14 = sshll.u32 %s1149_s27, 9 }
  0x47   : > { %s1513_s12 = scalar_select %p1329_p7, 1, 0 }
  0x48   : > { %s791_s19 = sshll.u32 %s264_s18, 5  ;;  %s1339_s11 = scalar_lea.hbm %s1496_s0, %s833_s14 }
  0x49   : > { %s268_s29 = scalar_lea.vmem [#allocation2], %s791_s19  ;;  %p1343_p11 = pnand %p888_p9, %p44_p3 }
  0x4a   : > { %s275_s10 = sshll.u32 %s268_s29, 4  ;;  %s1347_s16 = scalar_lea.sflag [#allocation3], %s264_s18  ;;  %s1341_s10 = int_to_ptr.vmem [resolvable:$true] %s275_s10 }
  0x4b   : > { %s1017_s22 = scalar_lea.hbm %s1339_s11, 512  ;;  %p1019_p0 = pneg %p1343_p11 }
  0x4c   : > { %p1018_p12 = scmp.ne.s32.totalorder %s1339_s11, %s1017_s22  ;;  %s1022_s20 = scalar_lea.hbm %s1496_s0, 1024 }
  0x4d   : > { %p1023_p13 = scmp.lt.u32.totalorder %s1339_s11, %s1496_s0  ;;  %p1024_p6 = scmp.lt.u32.totalorder %s1022_s20, %s1017_s22 }
  0x4e   : > { %p1020_p2 = pnand %p1019_p0, %p1018_p12  ;;  %p1026_p3 = scmp.lt.u32.totalorder %s1017_s22, %s1339_s11 }
  0x4f   : > { %p1025_p10 = por %p1024_p6, %p1023_p13 }
  0x50   : > { %p1021_p1 = pneg %p1020_p2 }
  0x51   : > { %p1027_p5 = por %p1026_p3, %p1025_p10 }
  0x53   : > { %p1028_p9 = pnand %p1027_p5, %p1021_p1 }
  0x55   : > { %1031 = shalt.err (!%p1028_p9)
}
  0x56   : > { %s1032_s18 = scalar_lea.vmem %s1341_s10, 512  ;;  %s1157_s19 = smov [#allocation2]  }
  0x57   : > { %p1033_p12 = scmp.ne.s32.totalorder %s1341_s10, %s1032_s18  ;;  %s1037_s14 = sshll.u32 %s1157_s19, 4  ;;  %s1038_s14 = int_to_ptr.vmem [resolvable:$false] %s1037_s14 }
  0x58   : > { %s1039_s21 = scalar_lea.vmem %s1038_s14, 1024  ;;  %p1040_p4 = scmp.lt.s32.totalorder %s1341_s10, %s1038_s14 }
  0x59   : > { %p1035_p2 = pnand %p1033_p12, %p1019_p0  ;;  %p1041_p13 = scmp.lt.s32.totalorder %s1039_s21, %s1032_s18 }
  0x5b   : > { %p1036_p7 = pneg %p1035_p2  ;;  %p1042_p6 = por %p1041_p13, %p1040_p4 }
  0x5d   : > { %p1043_p10 = pnand %p1042_p6, %p1036_p7 }
  0x5f   : > { %1046 = shalt.err (!%p1043_p10)
}
  0x60   : > { %s1515_s22 = smov 128   ;;  %287 = sbr.rel (%p1243_p8) target bundleno = 608 (0x260), region = 44 }
  0x61   : > { %878 = dma.hbm_to_vmem [thread:$0]  (!%p1343_p11), %s1339_s11, 512, %s1341_s10, %s1347_s16, %s1515_s22, %s1515_s22, %s1156_s23  }
  0x62   : > { %s1381_s20 = sand.u32 (!%p1243_p8), 1, %s1141_s25   ;;  %p1516_p4 = scmp.ne.s32.totalorder (!%p1243_p8), %s1508_s30, 0 }
  0x63   : > { %s1384_s29 = sshll.u32 (!%p1243_p8), %s1381_s20, 5  ;;  %s290_s15 = scalar_lea.sflag (!%p1243_p8), [#allocation3], %s1381_s20 }
  0x64   : > { %s293_s18 = scalar_lea.vmem (!%p1243_p8), [#allocation2], %s1384_s29 }
  0x67   : > { %1120 = dma.done.wait (%p1516_p4), %s290_s15, 512  }
  0x68   : > { %1122 = vsyncadd (%p1516_p4), %s290_s15, 4294966784  ;;  %p1517_p7 = scmp.eq.s32.totalorder %s1224_s28, 0 }
  0x6a   : > { %1124 = dma.done.wait (%p1517_p7), [#allocation6], 2560   ;;  %p1518_p8 = pmov %p1517_p7 }
  0x6b   : > { %v933_v0 = vld [vmem:[#allocation5] sm:$0xff]   ;;  %v934_v1 = vld [vmem:[#allocation5 + $0x8] sm:$0xff]   ;;  %v935_v2 = vld [vmem:[#allocation5 + $0x10] sm:$0xff]   ;;  %vm386_vm0 = vcmask 523264   ;;  %v1158_v26 = vmov 0   ;;  %s329_s19 = scalar_lea.vmem [#allocation8], %s1384_s29 }
  0x6c   : > { %1126 = vsyncadd (%p1518_p8), [#allocation6], 4294964736  ;;  %842 = vmatprep.subr.bf16.mxu0 %v933_v0  ;;  %v341_v3 = vld [vmem:[%s293_s18] sm:$0xff]  ;;  %v342_v4 = vld [vmem:[%s293_s18 + $0x8] sm:$0xff]  ;;  %576 = vmatprep.mubr.bf16.mxu1 %v1158_v26  ;;  %s336_s14 = scalar_lea.vmem [#allocation9], %s1384_s29  ;;  %s646_s21 = sshll.u32 %s329_s19, 4  ;;  %s1410_s21 = int_to_ptr.vmem [resolvable:$true] %s646_s21 }
  0x6d   : > { %843 = vmatpush3.bf16.msra.mxu0 %v933_v0  ;;  %v345_v5 = vpack.c.bf16 %v342_v4, %v341_v3  ;;  %v937_v6 = vld [vmem:[#allocation7 + $0x4] ss:$8 sps:$4 sm:$0xff]   ;;  %v939_v7 = vld [vmem:[#allocation7] ss:$8 sps:$4 sm:$0xff]   ;;  %v940_v8 = vld [vmem:[#allocation7 + $0x14] ss:$8 sps:$4 sm:$0xff]  }
  0x6e   : > { %844 = vmatprep.subr.bf16.mxu0 %v934_v1  ;;  %v936_v9 = vld [vmem:[#allocation5 + $0x18] sm:$0xff]   ;;  %544 = vmatprep.subr.bf16.mxu1 %v937_v6  ;;  %v943_v11 = vld [vmem:[#allocation7 + $0x24] ss:$8 sps:$4 sm:$0xff]   ;;  %v343_v12 = vld [vmem:[%s293_s18 + $0x10] sm:$0xff]  ;;  %s662_s22 = sshll.u32 %s336_s14, 4  ;;  %s834_s15 = sshll.u32 %s1224_s28, 9  ;;  %s1412_s22 = int_to_ptr.vmem [resolvable:$true] %s662_s22 }
  0x6f   : > { %850 = vmatprep.mubr.msk.bf16.mxu0 %vm386_vm0, %v345_v5  ;;  %545 = vmatpush1.bf16.msra.mxu1 %v939_v7  ;;  %v942_v10 = vld [vmem:[#allocation7 + $0x10] ss:$8 sps:$4 sm:$0xff]   ;;  %v945_v14 = vld [vmem:[#allocation7 + $0x20] ss:$8 sps:$4 sm:$0xff]   ;;  %v946_v16 = vld [vmem:[#allocation7 + $0x34] ss:$8 sps:$4 sm:$0xff]   ;;  %s1417_s30 = scalar_lea.hbm %s1502_s6, %s834_s15  ;;  %s1422_s23 = scalar_lea.hbm %s1503_s7, %s834_s15 }
  0x70   : > { %546 = vmatprep.subr.bf16.mxu1 %v940_v8  ;;  %v344_v13 = vld [vmem:[%s293_s18 + $0x18] sm:$0xff]  ;;  %v949_v18 = vld [vmem:[#allocation7 + $0x44] ss:$8 sps:$4 sm:$0xff]   ;;  %v951_v19 = vld [vmem:[#allocation7 + $0x40] ss:$8 sps:$4 sm:$0xff]   ;;  %s628_s11 = scalar_lea.sflag [#allocation4], %s1381_s20 }
  0x71   : > { %845 = vmatpush3.bf16.msra.mxu0 %v934_v1  ;;  %v346_v15 = vpack.c.bf16 %v344_v13, %v343_v12  ;;  %v948_v17 = vld [vmem:[#allocation7 + $0x30] ss:$8 sps:$4 sm:$0xff]   ;;  %v952_v20 = vld [vmem:[#allocation7 + $0x54] ss:$8 sps:$4 sm:$0xff]   ;;  %v955_v22 = vld [vmem:[#allocation7 + $0x64] ss:$8 sps:$4 sm:$0xff]  }
  0x72   : > { %846 = vmatprep.subr.bf16.mxu0 %v935_v2  ;;  %v954_v21 = vld [vmem:[#allocation7 + $0x50] ss:$8 sps:$4 sm:$0xff]   ;;  %v957_v23 = vld [vmem:[#allocation7 + $0x60] ss:$8 sps:$4 sm:$0xff]   ;;  %v958_v24 = vld [vmem:[#allocation7 + $0x74] ss:$8 sps:$4 sm:$0xff]  }
  0x73   : > { %547 = vmatpush1.bf16.msra.mxu1 %v942_v10  ;;  %v960_v25 = vld [vmem:[#allocation7 + $0x70] ss:$8 sps:$4 sm:$0xff]   ;;  %v800_v27 = vld [vmem:[%s1498_s2] ss:$0 sm:$0xff]  ;;  %s1047_s10 = scalar_lea.vmem %s1410_s21, 512  ;;  %p1519_p0 = scmp.ne.s32.totalorder %s1513_s12, 0 }
  0x74   : > { %548 = vmatprep.subr.bf16.mxu1 %v943_v11  ;;  %v823_v42 = vld [vmem:[%s1500_s4] ss:$0 sm:$0xff]  ;;  %p1048_p11 = scmp.ne.s32.totalorder %s1410_s21, %s1047_s10  ;;  %s1159_s16 = smov [#allocation8]  }
  0x75   : > { %847 = vmatpush3.bf16.msra.mxu0 %v935_v2  ;;  %v824_v43 = vld [vmem:[%s1501_s5] ss:$0 sm:$0xff]  ;;  %s1051_s29 = sshll.u32 %s1159_s16, 4  ;;  %s1052_s29 = int_to_ptr.vmem [resolvable:$false] %s1051_s29 }
  0x76   : > { %848 = vmatprep.subr.bf16.mxu0 %v936_v9  ;;  %p1049_p1 = pnand %p1048_p11, %p1519_p0  ;;  %s1053_s18 = scalar_lea.vmem %s1052_s29, 1024 }
  0x77   : > { %549 = vmatpush1.bf16.msra.mxu1 %v945_v14  ;;  %p1054_p5 = scmp.lt.s32.totalorder %s1410_s21, %s1052_s29  ;;  %p1055_p9 = scmp.lt.s32.totalorder %s1053_s18, %s1047_s10 }
  0x78   : > { %550 = vmatprep.subr.bf16.mxu1 %v946_v16  ;;  %p1050_p3 = pneg %p1049_p1 }
  0x79   : > { %849 = vmatpush3.bf16.msra.mxu0 %v936_v9  ;;  %p1056_p12 = por %p1055_p9, %p1054_p5 }
  0x7b   : > { %551 = vmatpush1.bf16.msra.mxu1 %v948_v17  ;;  %p1057_p2 = pnand %p1056_p12, %p1050_p3 }
  0x7c   : > { %851 = vmatmul.mubr.msk.bf16.vlgmr.msra.gmra.mrb[0].mxu0 %vm386_vm0, %v346_v15  ;;  %552 = vmatprep.subr.bf16.mxu1 %v949_v18 }
  0x7f   : > { %553 = vmatpush1.bf16.msra.mxu1 %v951_v19 }
  0x80   : > { %554 = vmatprep.subr.bf16.mxu1 %v952_v20 }
  0x83   : > { %555 = vmatpush1.bf16.msra.mxu1 %v954_v21 }
  0x84   : > { %556 = vmatprep.subr.bf16.mxu1 %v955_v22 }
  0x87   : > { %557 = vmatpush1.bf16.msra.mxu1 %v957_v23 }
  0x88   : > { %558 = vmatprep.subr.bf16.mxu1 %v958_v24 }
  0x8b   : > { %559 = vmatpush1.bf16.msra.mxu1 %v960_v25 }
 0x14f   : > { %v852_v28 = vpop.f32.mrb[0].mxu0 }
 0x150   : > { %v436_v29 = vadd.f32 %v852_v28, %v800_v27  ;;  %v427_v30 = vpop.f32.mrb[1].mxu0 }
 0x151   : > { %v428_v31 = vadd.f32 %v800_v27, %v427_v30  ;;  %v853_v32 = vpop.f32.mrb[2].mxu0 }
 0x152   : > { %v439_v33 = vadd.f32 %v853_v32, %v800_v27  ;;  %v430_v34 = vpop.f32.mrb[3].mxu0  ;;  %v444_v36 = vmax.f32 %v436_v29, 0.0 }
 0x153   : > { %v431_v35 = vadd.f32 %v800_v27, %v430_v34  ;;  %v442_v38 = vmax.f32 %v428_v31, 0.0 }
 0x154   : > { %v445_v37 = vmax.f32 %v439_v33, 0.0 }
 0x155   : > { %v443_v39 = vmax.f32 %v431_v35, 0.0 }
 0x156   : > { %v447_v40 = vpack.c.bf16 %v445_v37, %v444_v36 }
 0x157   : > { %v446_v41 = vpack.c.bf16 %v443_v39, %v442_v38 }
 0x159   : > { %577 = vmatmul.mubr.bf16.vlgmr.msra.gmra.mrb[0].mxu1 %v446_v41 }
 0x15a   : > { %586 = vmatprep.mubr.bf16.mxu1 %v1158_v26 }
 0x161   : > { %587 = vmatmul.mubr.bf16.gmra.mrb[4].mxu1 %v447_v40 }
 0x22c   : > { %v578_v44 = vpop.f32.mrb[0].mxu1 }
 0x22d   : > { %v604_v45 = vadd.f32 %v823_v42, %v578_v44  ;;  %v580_v46 = vpop.f32.mrb[1].mxu1 }
 0x22e   : > { %v619_v47 = vadd.f32 %v824_v43, %v580_v46  ;;  %v582_v48 = vpop.f32.mrb[2].mxu1 }
 0x22f   : > { %608 = vst [vmem:[%s329_s19] sm:$0xff] %v604_v45  ;;  %v605_v49 = vadd.f32 %v823_v42, %v582_v48  ;;  %v584_v50 = vpop.f32.mrb[3].mxu1 }
 0x230   : > { %623 = vst [vmem:[%s336_s14] sm:$0xff] %v619_v47  ;;  %v620_v51 = vadd.f32 %v824_v43, %v584_v50 }
 0x231   : > { %609 = vst [vmem:[%s329_s19 + $0x8] sm:$0xff] %v605_v49 }
 0x232   : > { %624 = vst [vmem:[%s336_s14 + $0x8] sm:$0xff] %v620_v51 }
 0x234   : > { %v588_v52 = vpop.f32.mrb[4].mxu1 }
 0x235   : > { %v606_v53 = vadd.f32 %v823_v42, %v588_v52  ;;  %v590_v54 = vpop.f32.mrb[5].mxu1 }
 0x236   : > { %v621_v55 = vadd.f32 %v824_v43, %v590_v54  ;;  %v592_v56 = vpop.f32.mrb[6].mxu1 }
 0x237   : > { %610 = vst [vmem:[%s329_s19 + $0x10] sm:$0xff] %v606_v53  ;;  %v607_v57 = vadd.f32 %v823_v42, %v592_v56  ;;  %v594_v58 = vpop.f32.mrb[7].mxu1 }
 0x238   : > { %625 = vst [vmem:[%s336_s14 + $0x10] sm:$0xff] %v621_v55  ;;  %v622_v59 = vadd.f32 %v824_v43, %v594_v58 }
 0x239   : > { %611 = vst [vmem:[%s329_s19 + $0x18] sm:$0xff] %v607_v57 }
 0x23a   : > { %626 = vst [vmem:[%s336_s14 + $0x18] sm:$0xff] %v622_v59 }
 0x23b   : > { %1060 = shalt.err (!%p1057_p2)
}
 0x23c   : > { %s1061_s19 = scalar_lea.hbm %s1417_s30, 512  ;;  %s1065_s28 = scalar_lea.hbm %s1502_s6, 1024 }
 0x23d   : > { %p1062_p13 = scmp.ne.s32.totalorder %s1417_s30, %s1061_s19  ;;  %p1066_p4 = scmp.lt.u32.totalorder %s1417_s30, %s1502_s6 }
 0x23e   : > { %p1067_p7 = scmp.lt.u32.totalorder %s1065_s28, %s1061_s19  ;;  %p1069_p11 = scmp.lt.u32.totalorder %s1061_s19, %s1417_s30 }
 0x23f   : > { %p1063_p6 = pnand %p1062_p13, %p1519_p0 }
 0x240   : > { %p1068_p8 = por %p1067_p7, %p1066_p4 }
 0x241   : > { %p1064_p10 = pneg %p1063_p6 }
 0x242   : > { %p1070_p1 = por %p1069_p11, %p1068_p8 }
 0x244   : > { %p1071_p3 = pnand %p1070_p1, %p1064_p10 }
 0x246   : > { %1074 = shalt.err (!%p1071_p3)
}
 0x247   : > { %s1160_s10 = smov 128   ;;  %s1161_s29 = smov 8  }
 0x248   : > { %864 = dma.vmem_to_hbm [thread:$0]  (%p1519_p0), %s1410_s21, 512, %s1417_s30, %s628_s11, %s1160_s10, %s1160_s10, %s1161_s29  }
 0x249   : > { %s633_s18 = scalar_lea.sflag [#allocation10], %s1381_s20  ;;  %s1075_s19 = scalar_lea.vmem %s1412_s22, 512 }
 0x24a   : > { %p1076_p5 = scmp.ne.s32.totalorder %s1412_s22, %s1075_s19  ;;  %s1162_s14 = smov [#allocation9]  }
 0x24b   : > { %s1079_s15 = sshll.u32 %s1162_s14, 4  ;;  %s1080_s15 = int_to_ptr.vmem [resolvable:$false] %s1079_s15 }
 0x24c   : > { %p1077_p9 = pnand %p1076_p5, %p1519_p0  ;;  %s1081_s28 = scalar_lea.vmem %s1080_s15, 1024 }
 0x24d   : > { %p1082_p2 = scmp.lt.s32.totalorder %s1412_s22, %s1080_s15  ;;  %p1083_p13 = scmp.lt.s32.totalorder %s1081_s28, %s1075_s19 }
 0x24e   : > { %p1078_p12 = pneg %p1077_p9 }
 0x24f   : > { %p1084_p6 = por %p1083_p13, %p1082_p2 }
 0x251   : > { %p1085_p10 = pnand %p1084_p6, %p1078_p12 }
 0x253   : > { %1088 = shalt.err (!%p1085_p10)
}
 0x254   : > { %s1089_s21 = scalar_lea.hbm %s1422_s23, 512  ;;  %s1093_s9 = scalar_lea.hbm %s1503_s7, 1024 }
 0x255   : > { %p1090_p4 = scmp.ne.s32.totalorder %s1422_s23, %s1089_s21  ;;  %p1094_p11 = scmp.lt.u32.totalorder %s1422_s23, %s1503_s7 }
 0x256   : > { %p1095_p1 = scmp.lt.u32.totalorder %s1093_s9, %s1089_s21  ;;  %p1097_p5 = scmp.lt.u32.totalorder %s1089_s21, %s1422_s23 }
 0x257   : > { %p1091_p7 = pnand %p1090_p4, %p1519_p0 }
 0x258   : > { %p1096_p3 = por %p1095_p1, %p1094_p11 }
 0x259   : > { %p1092_p8 = pneg %p1091_p7 }
 0x25a   : > { %p1098_p9 = por %p1097_p5, %p1096_p3 }
 0x25c   : > { %p1099_p12 = pnand %p1098_p9, %p1092_p8 }
 0x25e   : > { %1102 = shalt.err (!%p1099_p12)
}
 0x25f   : > { %865 = dma.vmem_to_hbm [thread:$0]  (%p1519_p0), %s1412_s22, 512, %s1422_s23, %s633_s18, %s1160_s10, %s1160_s10, %s1161_s29  }
 0x260 PF: > { %s677_s19 = sand.u32 1, %s1137_s24   ;;  %p1520_p2 = scmp.ne.s32.totalorder %s1509_s8, 0 }
 0x261   : > { %p1521_p13 = scmp.ge.s32.totalorder %s1149_s27, 2  ;;  %s678_s15 = scalar_lea.sflag [#allocation4], %s677_s19 }
 0x263   : > { %p880_p6 = pnand %p1521_p13, %p1520_p2 }
 0x265   : > { %1128 = dma.done.wait (!%p880_p6), %s678_s15, 512  }
 0x266   : > { %1130 = vsyncadd (!%p880_p6), %s678_s15, 4294966784  ;;  %s687_s12 = scalar_lea.sflag [#allocation10], %s677_s19 }
 0x267   : > { %1132 = dma.done.wait (!%p880_p6), %s687_s12, 512  }
 0x268   : > { %1134 = vsyncadd (!%p880_p6), %s687_s12, 4294966784  ;;  %p25_p0 = scmp.ge.s32.totalorder %s1316_s13, 4   ;;  %s1522_s24 = smov %s1141_s25 }
 0x269   : > { %s1523_s25 = smov %s1145_s26  ;;  %s1524_s26 = smov %s1325_s17 }
 0x26a   : > { %s1525_s27 = smov %s1316_s13  ;;  %27 = sbr.rel (!%p25_p0) target bundleno = 8 (0x8), region = 114 }
 0x271   :  { %692 = vsyncpa [#allocation3], 1 }
 0x272   :  { %694 = vsyncpa [#allocation3 + $0x1], 1 }
 0x273   :  { %695 = vsyncpa [#allocation6], 1 }
 0x274   :  { %696 = vsyncpa [#allocation4], 1 }
 0x275   :  { %698 = vsyncpa [#allocation4 + $0x1], 1 }
 0x276   :  { %699 = vsyncpa [#allocation10], 1 }
 0x277   :  { %701 = vsyncpa [#allocation10 + $0x1], 1 }

</bundles_post_ra>
